<compile_context>
chip_gen: v5e
topology: v5e:2x2
jax: 0.10.0
libtpu: 0.0.40
codegen_flags: <defaults>
</compile_context>

<pallas_src>
import functools

import jax
import jax.numpy as jnp
from jax import lax
from jax.experimental import pallas as pl
from jax.experimental.pallas import tpu as pltpu


def _avg_pool_kernel(seg_ref, feat_ref, sum_ref, cnt_ref, acc_ref, cnt_acc_ref,
                     *, n_total, tiles_per_core):
    c = pl.program_id(0)          # core-split axis ("parallel")
    k = pl.program_id(1)          # node-tile reduction axis ("arbitrary")

    @pl.when(k == 0)
    def _init():
        acc_ref[...] = jnp.zeros_like(acc_ref)
        cnt_acc_ref[...] = jnp.zeros_like(cnt_acc_ref)

    num_graphs = acc_ref.shape[0]
    tn = seg_ref.shape[1]                       # node tile size

    # Intended (unclamped) global node offset of this tile. The index_maps
    # clamp the DMA to a valid block, so over-run tiles are loaded-but-masked
    # (base >= n_total => every column invalid => zero contribution).
    base = (c * tiles_per_core + k) * tn

    seg = seg_ref[...]                          # (1, TN) int32, -1 = padding

    # Validity of each node slot in this tile (ragged tail / clamped tiles).
    col_iota = lax.broadcasted_iota(jnp.int32, (1, tn), 1)
    col_valid = (base + col_iota) < n_total               # (1, TN) bool
    row_iota = lax.broadcasted_iota(jnp.int32, (tn, 1), 0)
    row_valid = (base + row_iota) < n_total               # (TN, 1) bool

    # One-hot membership (B, TN). Padded rows (seg == -1) never match a graph
    # id; uninitialized tail garbage is killed by col_valid.
    row_ids = lax.broadcasted_iota(jnp.int32, (num_graphs, tn), 0)
    member = (row_ids == seg) & col_valid                 # (B, TN) bool
    onehot = member.astype(feat_ref.dtype)                # MXU operand dtype

    # Mask invalid feature rows (uninitialized tail of a ragged block could be
    # NaN; 0 * NaN would poison the accumulator). VALU select is free filler
    # in this HBM-bound kernel.
    feat_t = jnp.where(row_valid, feat_ref[...], 0)

    # Segment-sum on the MXU, f32 accumulation in resident VMEM scratch.
    acc_ref[...] += jnp.dot(onehot, feat_t,
                            preferred_element_type=jnp.float32)
    # Per-graph node counts: XLU row-reduce of the membership mask (f32 so
    # large graphs don't lose integer precision).
    cnt_acc_ref[...] += jnp.sum(member.astype(jnp.float32), axis=1,
                                keepdims=True)

    @pl.when(k == pl.num_programs(1) - 1)
    def _finalize():
        sum_ref[...] = acc_ref[...]
        cnt_ref[...] = cnt_acc_ref[...]


@functools.partial(jax.jit,
                   static_argnames=("num_graphs", "node_tile", "num_cores"))
def avg_pooling(feat, seg_ids, *, num_graphs, node_tile=512, num_cores=2):
    """AvgPooling readout: per-graph mean of node features.

    feat:    [N, D] float node features (f32 or bf16; bf16 halves HBM traffic).
    seg_ids: [N] int graph id per node; -1 marks padded rows (ignored).
    returns: [num_graphs, D] in feat.dtype. Empty graphs yield zeros.
    """
    n, d = feat.shape
    assert node_tile % 128 == 0, "node_tile must be a multiple of 128"

    seg_row = seg_ids.reshape(1, n).astype(jnp.int32)

    num_tiles = pl.cdiv(n, node_tile)
    # Don't create more core-splits than there are tiles of work.
    num_cores = max(1, min(num_cores, num_tiles))
    tiles_per_core = pl.cdiv(num_tiles, num_cores)

    def tile_idx(c, k):
        # Clamp so the DMA block index always targets a real block; the
        # in-kernel validity mask zeroes out any over-run tiles.
        return jnp.minimum(c * tiles_per_core + k, num_tiles - 1)

    kernel = functools.partial(_avg_pool_kernel, n_total=n,
                               tiles_per_core=tiles_per_core)

    sums, counts = pl.pallas_call(
        kernel,
        out_shape=(
            jax.ShapeDtypeStruct((num_cores, num_graphs, d), jnp.float32),
            jax.ShapeDtypeStruct((num_cores, num_graphs, 1), jnp.float32),
        ),
        grid_spec=pltpu.PrefetchScalarGridSpec(
            num_scalar_prefetch=0,
            grid=(num_cores, tiles_per_core),
            in_specs=[
                # segment ids: (1, node_tile) row per tile
                pl.BlockSpec((1, node_tile),
                             lambda c, k: (0, tile_idx(c, k))),
                # node features: (node_tile, D) tile (streamed from HBM)
                pl.BlockSpec((node_tile, d),
                             lambda c, k: (tile_idx(c, k), 0)),
            ],
            # one partial [B, D] sum slab + [B, 1] count slab per core,
            # resident across the k (reduction) axis
            out_specs=[
                pl.BlockSpec((None, num_graphs, d), lambda c, k: (c, 0, 0)),
                pl.BlockSpec((None, num_graphs, 1), lambda c, k: (c, 0, 0)),
            ],
            scratch_shapes=[
                pltpu.VMEM((num_graphs, d), jnp.float32),   # f32 sum acc
                pltpu.VMEM((num_graphs, 1), jnp.float32),   # f32 count acc
            ],
        ),
        compiler_params=pltpu.CompilerParams(
            dimension_semantics=("parallel", "arbitrary"),
        ),
    )(seg_row, feat)

    # Trailing O(B*D) finalize: reduce per-core partials, guard empty graphs.
    total_sum = sums.sum(axis=0)                       # [B, D]
    total_cnt = jnp.maximum(counts.sum(axis=0), 1.0)   # [B, 1]
    return (total_sum / total_cnt).astype(feat.dtype)


if __name__ == "__main__":
    key = jax.random.PRNGKey(0)

    # A "batched graph" with 2 graphs, hidden_dim = 32, N = 300 nodes total
    # (deliberately not a multiple of the node tile to exercise the ragged
    # tail and the per-core split masking).
    batch_num_nodes = jnp.array([130, 170], dtype=jnp.int32)
    num_graphs = int(batch_num_nodes.shape[0])
    n_total = int(batch_num_nodes.sum())
    hidden_dim = 32

    feat = jax.random.normal(key, (n_total, hidden_dim), dtype=jnp.float32)
    seg_ids = jnp.repeat(jnp.arange(num_graphs, dtype=jnp.int32),
                         batch_num_nodes, total_repeat_length=n_total)

    # Pure-JAX f32 reference (kernel now matmuls in feat's dtype, so the f32
    # path should match the f32 reference closely).
    sums_ref = jax.ops.segment_sum(feat, seg_ids, num_segments=num_graphs)
    ref = sums_ref / batch_num_nodes[:, None].astype(jnp.float32)

    # Default (large) tile: whole batch in one tile on one core.
    out_big = jax.block_until_ready(
        avg_pooling(feat, seg_ids, num_graphs=num_graphs))
    # Small tile: multi-tile reduction + 2-way core split + ragged tail +
    # clamped over-run tile on the second core.
    out_small = jax.block_until_ready(
        avg_pooling(feat, seg_ids, num_graphs=num_graphs, node_tile=128))

    for out in (out_big, out_small):
        assert out.shape == (num_graphs, hidden_dim)
        assert jnp.allclose(out, ref, atol=1e-4, rtol=1e-4), \
            "mismatch vs reference"
    print("KERNEL_OK")
</pallas_src>

<mosaic_0001>
module attributes {stable_mosaic.version = 11 : i64} {
  func.func @_avg_pool_kernel(%arg0: i32, %arg1: i32, %arg2: memref<1x512xi32, #tpu.memory_space<vmem>>, %arg3: memref<512x32xf32, #tpu.memory_space<vmem>>, %arg4: memref<1x2x32xf32, #tpu.memory_space<vmem>>, %arg5: memref<1x2x1xf32, #tpu.memory_space<vmem>>, %arg6: memref<2x32xf32, #tpu.memory_space<vmem>>, %arg7: memref<2x1xf32, #tpu.memory_space<vmem>>) attributes {dimension_semantics = [#tpu.dimension_semantics<parallel>, #tpu.dimension_semantics<arbitrary>], iteration_bounds = array<i64: 1, 1>, scalar_prefetch = 0 : i64, scratch_operands = 2 : i64, tpu.core_type = #tpu.core_type<tc>, window_params = [{transform_indices = @transform_0, window_bounds = array<i64: 1, 512>}, {transform_indices = @transform_1, window_bounds = array<i64: 512, 32>}, {transform_indices = @transform_2, window_bounds = array<i64: 1, 2, 32>}, {transform_indices = @transform_3, window_bounds = array<i64: 1, 2, 1>}]} {
    %c0_i32 = arith.constant 0 : i32
    %0 = arith.cmpi eq, %arg1, %c0_i32 : i32
    %1 = arith.extui %0 : i1 to i32
    %c0_i32_0 = arith.constant 0 : i32
    %2 = arith.cmpi ne, %1, %c0_i32_0 : i32
    scf.if %2 {
      %cst_17 = arith.constant 0.000000e+00 : f32
      %44 = vector.broadcast %cst_17 : f32 to vector<2x32xf32>
      %c0_18 = arith.constant 0 : index
      %c0_19 = arith.constant 0 : index
      %45 = vector.load %arg6[%c0_18, %c0_19] : memref<2x32xf32, #tpu.memory_space<vmem>>, vector<2x32xf32>
      tpu.vector_store %arg6[%c0_18, %c0_19], %44 {strides = array<i32>} : memref<2x32xf32, #tpu.memory_space<vmem>>, vector<2x32xf32>,
      %cst_20 = arith.constant 0.000000e+00 : f32
      %46 = vector.broadcast %cst_20 : f32 to vector<2x1xf32>
      %c0_21 = arith.constant 0 : index
      %c0_22 = arith.constant 0 : index
      %47 = vector.load %arg7[%c0_21, %c0_22] : memref<2x1xf32, #tpu.memory_space<vmem>>, vector<2x1xf32>
      tpu.vector_store %arg7[%c0_21, %c0_22], %46 {strides = array<i32>} : memref<2x1xf32, #tpu.memory_space<vmem>>, vector<2x1xf32>,
    } else {
    }
    %c1_i32 = arith.constant 1 : i32
    %3 = arith.muli %arg0, %c1_i32 : i32
    %4 = arith.addi %3, %arg1 : i32
    %c512_i32 = arith.constant 512 : i32
    %5 = arith.muli %4, %c512_i32 : i32
    %c0 = arith.constant 0 : index
    %c0_1 = arith.constant 0 : index
    %6 = vector.load %arg2[%c0, %c0_1] : memref<1x512xi32, #tpu.memory_space<vmem>>, vector<1x512xi32>
    %7 = tpu.iota {dimensions = array<i32: 1>} : vector<1x512xi32>
    %8 = vector.broadcast %5 : i32 to vector<1x512xi32>
    %9 = arith.addi %8, %7 : vector<1x512xi32>
    %c300_i32 = arith.constant 300 : i32
    %10 = vector.broadcast %c300_i32 : i32 to vector<1x512xi32>
    %11 = arith.cmpi slt, %9, %10 : vector<1x512xi32>
    %12 = tpu.iota {dimensions = array<i32: 0>} : vector<512x1xi32>
    %13 = vector.broadcast %5 : i32 to vector<512x1xi32>
    %14 = arith.addi %13, %12 : vector<512x1xi32>
    %c300_i32_2 = arith.constant 300 : i32
    %15 = vector.broadcast %c300_i32_2 : i32 to vector<512x1xi32>
    %16 = arith.cmpi slt, %14, %15 : vector<512x1xi32>
    %17 = tpu.iota {dimensions = array<i32: 0>} : vector<2x512xi32>
    %18 = vector.broadcast %6 : vector<1x512xi32> to vector<2x512xi32>
    %19 = arith.cmpi eq, %17, %18 : vector<2x512xi32>
    %20 = vector.broadcast %11 : vector<1x512xi1> to vector<2x512xi1>
    %21 = arith.andi %19, %20 : vector<2x512xi1>
    %22 = arith.extui %21 : vector<2x512xi1> to vector<2x512xi32>
    %23 = arith.sitofp %22 : vector<2x512xi32> to vector<2x512xf32>
    %c0_3 = arith.constant 0 : index
    %c0_4 = arith.constant 0 : index
    %24 = vector.load %arg3[%c0_3, %c0_4] : memref<512x32xf32, #tpu.memory_space<vmem>>, vector<512x32xf32>
    %c0_i32_5 = arith.constant 0 : i32
    %25 = arith.sitofp %c0_i32_5 : i32 to f32
    %26 = vector.shape_cast %16 : vector<512x1xi1> to vector<512x1xi1>
    %27 = vector.broadcast %26 : vector<512x1xi1> to vector<512x32xi1>
    %28 = vector.broadcast %25 : f32 to vector<512x32xf32>
    %29 = arith.select %27, %24, %28 : vector<512x32xi1>, vector<512x32xf32>
    %c0_6 = arith.constant 0 : index
    %c0_7 = arith.constant 0 : index
    %30 = vector.load %arg6[%c0_6, %c0_7] : memref<2x32xf32, #tpu.memory_space<vmem>>, vector<2x32xf32>
    %cst = arith.constant dense<0.000000e+00> : vector<2x32xf32>
    %31 = tpu.matmul %23, %29, %cst {dimension_numbers = #tpu.dot_dimension_numbers<[1], [0], [0], [1], [0, 0, 1, 1], [], []>} : vector<2x512xf32>, vector<512x32xf32>, vector<2x32xf32> -> vector<2x32xf32>
    %32 = arith.addf %30, %31 : vector<2x32xf32>
    %c0_8 = arith.constant 0 : index
    %c0_9 = arith.constant 0 : index
    %33 = vector.load %arg6[%c0_8, %c0_9] : memref<2x32xf32, #tpu.memory_space<vmem>>, vector<2x32xf32>
    tpu.vector_store %arg6[%c0_8, %c0_9], %32 {strides = array<i32>} : memref<2x32xf32, #tpu.memory_space<vmem>>, vector<2x32xf32>,
    %c0_10 = arith.constant 0 : index
    %c0_11 = arith.constant 0 : index
    %34 = vector.load %arg7[%c0_10, %c0_11] : memref<2x1xf32, #tpu.memory_space<vmem>>, vector<2x1xf32>
    %35 = arith.extui %21 : vector<2x512xi1> to vector<2x512xi32>
    %36 = arith.sitofp %35 : vector<2x512xi32> to vector<2x512xf32>
    %cst_12 = arith.constant dense<0.000000e+00> : vector<2xf32>
    %37 = vector.multi_reduction <add>, %36, %cst_12 [1] : vector<2x512xf32> to vector<2xf32>
    %38 = vector.shape_cast %37 : vector<2xf32> to vector<2x1xf32>
    %39 = arith.addf %34, %38 : vector<2x1xf32>
    %c0_13 = arith.constant 0 : index
    %c0_14 = arith.constant 0 : index
    %40 = vector.load %arg7[%c0_13, %c0_14] : memref<2x1xf32, #tpu.memory_space<vmem>>, vector<2x1xf32>
    tpu.vector_store %arg7[%c0_13, %c0_14], %39 {strides = array<i32>} : memref<2x1xf32, #tpu.memory_space<vmem>>, vector<2x1xf32>,
    %c0_i32_15 = arith.constant 0 : i32
    %41 = arith.cmpi eq, %arg1, %c0_i32_15 : i32
    %42 = arith.extui %41 : i1 to i32
    %c0_i32_16 = arith.constant 0 : i32
    %43 = arith.cmpi ne, %42, %c0_i32_16 : i32
    scf.if %43 {
      %c0_17 = arith.constant 0 : index
      %c0_18 = arith.constant 0 : index
      %44 = vector.load %arg6[%c0_17, %c0_18] : memref<2x32xf32, #tpu.memory_space<vmem>>, vector<2x32xf32>
      %c0_19 = arith.constant 0 : index
      %c0_20 = arith.constant 0 : index
      %c0_21 = arith.constant 0 : index
      %45 = vector.load %arg4[%c0_19, %c0_20, %c0_21] : memref<1x2x32xf32, #tpu.memory_space<vmem>>, vector<1x2x32xf32>
      %46 = vector.shape_cast %45 : vector<1x2x32xf32> to vector<2x32xf32>
      %47 = vector.shape_cast %44 : vector<2x32xf32> to vector<1x2x32xf32>
      tpu.vector_store %arg4[%c0_19, %c0_20, %c0_21], %47 {strides = array<i32>} : memref<1x2x32xf32, #tpu.memory_space<vmem>>, vector<1x2x32xf32>,
      %c0_22 = arith.constant 0 : index
      %c0_23 = arith.constant 0 : index
      %48 = vector.load %arg7[%c0_22, %c0_23] : memref<2x1xf32, #tpu.memory_space<vmem>>, vector<2x1xf32>
      %c0_24 = arith.constant 0 : index
      %c0_25 = arith.constant 0 : index
      %c0_26 = arith.constant 0 : index
      %49 = vector.load %arg5[%c0_24, %c0_25, %c0_26] : memref<1x2x1xf32, #tpu.memory_space<vmem>>, vector<1x2x1xf32>
      %50 = vector.shape_cast %49 : vector<1x2x1xf32> to vector<2x1xf32>
      %51 = vector.shape_cast %48 : vector<2x1xf32> to vector<1x2x1xf32>
      tpu.vector_store %arg5[%c0_24, %c0_25, %c0_26], %51 {strides = array<i32>} : memref<1x2x1xf32, #tpu.memory_space<vmem>>, vector<1x2x1xf32>,
    } else {
    }
    return
  }
  func.func @transform_0(%arg0: i32, %arg1: i32) -> (i32, i32) {
    %c1_i32 = arith.constant 1 : i32
    %0 = arith.muli %arg0, %c1_i32 : i32
    %1 = arith.addi %0, %arg1 : i32
    %c0_i32 = arith.constant 0 : i32
    %2 = arith.minsi %1, %c0_i32 : i32
    %c0_i32_0 = arith.constant 0 : i32
    %c0_i32_1 = arith.constant 0 : i32
    return %c0_i32_0, %2 : i32, i32
  }
  func.func @transform_1(%arg0: i32, %arg1: i32) -> (i32, i32) {
    %c1_i32 = arith.constant 1 : i32
    %0 = arith.muli %arg0, %c1_i32 : i32
    %1 = arith.addi %0, %arg1 : i32
    %c0_i32 = arith.constant 0 : i32
    %2 = arith.minsi %1, %c0_i32 : i32
    %c0_i32_0 = arith.constant 0 : i32
    %c0_i32_1 = arith.constant 0 : i32
    return %2, %c0_i32_0 : i32, i32
  }
  func.func @transform_2(%arg0: i32, %arg1: i32) -> (i32, i32, i32) {
    %c0_i32 = arith.constant 0 : i32
    %c0_i32_0 = arith.constant 0 : i32
    %c0_i32_1 = arith.constant 0 : i32
    return %arg0, %c0_i32, %c0_i32_0 : i32, i32, i32
  }
  func.func @transform_3(%arg0: i32, %arg1: i32) -> (i32, i32, i32) {
    %c0_i32 = arith.constant 0 : i32
    %c0_i32_0 = arith.constant 0 : i32
    %c0_i32_1 = arith.constant 0 : i32
    return %arg0, %c0_i32, %c0_i32_0 : i32, i32, i32
  }
}

</mosaic_0001>

<bundles_post_ra>
// kernel: avg_pooling.1
= control target key start
LH: loop header
LB: loop body
LE: loop exit
PB: predicated region body
PF: predicated region fallthrough
CT: control target
= control target key end

     0   :  { %v100_v0 = vlaneseq  ;;  %v722_v4 = vmov 0.0   ;;  %vm676_vm2 = vcmask 1041408   ;;  %v723_v51 = vmov 1.0   ;;  %s905_s1 = inlined_call_operand.vmem [shape: f32[300,32], index: 1, kind: input, shape index: {}]   ;;  %s906_s0 = inlined_call_operand.vmem [shape: s32[1,300], index: 0, kind: input, shape index: {}]   ;;  %s907_s3 = inlined_call_operand.vmem [shape: f32[1,2,1], index: 3, kind: output, shape index: {1}]   ;;  %s908_s2 = inlined_call_operand.vmem [shape: f32[1,2,32], index: 2, kind: output, shape index: {0}]  }
   0x1   :  { %v350_v1 = vld [vmem:[%s905_s1 + $0x78] sm:$0xff]  ;;  %v349_v3 = vld [vmem:[%s905_s1 + $0x70] sm:$0xff]  ;;  %667 = vmatpush.msra.mxu3 %v722_v4  ;;  %v348_v7 = vld [vmem:[%s905_s1 + $0x68] sm:$0xff]  ;;  %vm93_vm7 = vcmask 254976   ;;  %vm95_vm8 = vcmask 1024  }
   0x2   :  { %v366_v2 = vld [vmem:[%s905_s1 + $0xf8] sm:$0xff]  ;;  %592 = vmatpush.msra.mxu0 %v350_v1  ;;  %v365_v5 = vld [vmem:[%s905_s1 + $0xf0] sm:$0xff]  ;;  %v115_v6 = vshrl.u32 %v100_v0, 7  ;;  %v364_v8 = vld [vmem:[%s905_s1 + $0xe8] sm:$0xff]  ;;  %668 = vmatmul.f32.vlgmr.msra.gmra.mxu3 %v722_v4  ;;  %v101_v12 = vand.u32 127, %v100_v0 }
   0x3   :  { %612 = vmatpush.msra.mxu1 %v366_v2  ;;  %v347_v10 = vld [vmem:[%s905_s1 + $0x60] sm:$0xff]  ;;  %v346_v13 = vld [vmem:[%s905_s1 + $0x58] sm:$0xff]  ;;  %v372_v15 = vld [vmem:[%s905_s1 + $0x128] sm:$0xff]  ;;  %94 = vst.msk [vmem:[#allocation2] sm:$0x3] %vm93_vm7, %v722_v4 }
   0x4   :  { %593 = vmatpush.msra.mxu0 %v349_v3  ;;  %v152_v9 = vadd.s32 296, %v115_v6  ;;  %v363_v11 = vld [vmem:[%s905_s1 + $0xe0] sm:$0xff]  ;;  %v362_v14 = vld [vmem:[%s905_s1 + $0xd8] sm:$0xff]  ;;  %v345_v17 = vld [vmem:[%s905_s1 + $0x50] sm:$0xff]  ;;  %v103_v19 = vadd.s32 256, %v101_v12 }
   0x5   :  { %613 = vmatpush.msra.mxu1 %v365_v5  ;;  %v371_v16 = vld [vmem:[%s905_s1 + $0x120] sm:$0xff]  ;;  %v361_v18 = vld [vmem:[%s905_s1 + $0xd0] sm:$0xff]  ;;  %v370_v20 = vld [vmem:[%s905_s1 + $0x118] sm:$0xff]  ;;  %96 = vst.msk [vmem:[#allocation3] sm:$0x3] %vm95_vm8, %v722_v4 }
   0x6   :  { %594 = vmatpush.msra.mxu0 %v348_v7  ;;  %vm280_vm0 = vcmp.lt.s32.totalorder %v152_v9, 300  ;;  %v344_v21 = vld [vmem:[%s905_s1 + $0x48] sm:$0xff]  ;;  %v369_v23 = vld [vmem:[%s905_s1 + $0x110] sm:$0xff]  ;;  %v99_v24 = vld [vmem:[%s906_s0] sm:$0xf]  ;;  %vm112_vm1 = vcmp.lt.s32.totalorder %v103_v19, 300 }
   0x7   :  { %614 = vmatpush.msra.mxu1 %v364_v8  ;;  %718 = vmatpush.msk.msra.mxu2 %vm280_vm0, %v372_v15  ;;  %v360_v22 = vld [vmem:[%s905_s1 + $0xc8] sm:$0xff]  ;;  %v343_v25 = vld [vmem:[%s905_s1 + $0x40] sm:$0xff]  ;;  %v309_v27 = vperm.slane %v99_v24, 2  ;;  %v307_v28 = vperm.slane %v99_v24, 0  ;;  %v308_v29 = vperm.slane %v99_v24, 1  ;;  %v342_v31 = vld [vmem:[%s905_s1 + $0x38] sm:$0xff] }
   0x8   :  { %595 = vmatpush.msra.mxu0 %v347_v10  ;;  %v359_v26 = vld [vmem:[%s905_s1 + $0xc0] sm:$0xff]  ;;  %v368_v30 = vld [vmem:[%s905_s1 + $0x108] sm:$0xff]  ;;  %v358_v32 = vld [vmem:[%s905_s1 + $0xb8] sm:$0xff] }
   0x9   :  { %615 = vmatpush.msra.mxu1 %v363_v11  ;;  %643 = vmatpush.msra.mxu2 %v371_v16  ;;  %vm313_vm3 = vcmp.eq.s32.totalorder %v115_v6, %v309_v27  ;;  %vm818_vm4 = vcmp.eq.s32.totalorder %v115_v6, %v307_v28  ;;  %vm822_vm5 = vcmp.eq.s32.totalorder %v115_v6, %v308_v29  ;;  %v367_v35 = vld [vmem:[%s905_s1 + $0x100] sm:$0xff]  ;;  %v341_v39 = vld [vmem:[%s905_s1 + $0x30] sm:$0xff]  ;;  %v340_v46 = vld [vmem:[%s905_s1 + $0x28] sm:$0xff] }
   0xa   :  { %596 = vmatpush.msra.mxu0 %v346_v13  ;;  %vm830_vm6 = vmand %vm313_vm3, %vm112_vm1  ;;  %v713_v37 = vsel %vm818_vm4, 1.0, %v722_v4  ;;  %v714_v38 = vsel %vm822_vm5, 1.0, %v722_v4  ;;  %v357_v40 = vld [vmem:[%s905_s1 + $0xb0] sm:$0xff]  ;;  %v356_v47 = vld [vmem:[%s905_s1 + $0xa8] sm:$0xff] }
   0xb   :  { %616 = vmatpush.msra.mxu1 %v362_v14  ;;  %644 = vmatpush.msra.mxu2 %v370_v20  ;;  %v715_v41 = vsel %vm830_vm6, 1.0, %v722_v4  ;;  %v677_v42 = vsel %vm676_vm2, %v713_v37, 0.0  ;;  %v678_v43 = vsel %vm676_vm2, %v714_v38, 0.0  ;;  %v339_v49 = vld [vmem:[%s905_s1 + $0x20] sm:$0xff]  ;;  %v338_v52 = vld [vmem:[%s905_s1 + $0x18] sm:$0xff]  ;;  %v337_v54 = vld [vmem:[%s905_s1 + $0x10] sm:$0xff] }
   0xc   :  { %597 = vmatpush.msra.mxu0 %v345_v17  ;;  %v679_v44 = vadd.f32 %v678_v43, %v677_v42  ;;  %v680_v45 = vsel %vm676_vm2, %v715_v41, 0.0  ;;  %v355_v50 = vld [vmem:[%s905_s1 + $0xa0] sm:$0xff]  ;;  %v354_v53 = vld [vmem:[%s905_s1 + $0x98] sm:$0xff]  ;;  %v353_v55 = vld [vmem:[%s905_s1 + $0x90] sm:$0xff] }
   0xd   :  { %617 = vmatpush.msra.mxu1 %v361_v18  ;;  %645 = vmatpush.msra.mxu2 %v369_v23  ;;  %v336_v56 = vld [vmem:[%s905_s1 + $0x8] sm:$0xff]  ;;  %v335_v58 = vld [vmem:[%s905_s1] sm:$0xff] }
   0xe   :  { %598 = vmatpush.msra.mxu0 %v344_v21  ;;  %v681_v48 = vadd.f32 %v680_v45, %v679_v44  ;;  %v352_v57 = vld [vmem:[%s905_s1 + $0x88] sm:$0xff]  ;;  %v351_v59 = vld [vmem:[%s905_s1 + $0x80] sm:$0xff] }
   0xf   :  { %618 = vmatpush.msra.mxu1 %v360_v22  ;;  %646 = vmatpush.msra.mxu2 %v368_v30  ;;  %v675_v60 = vld [vmem:[#allocation3] sm:$0x3]  ;;  %v591_v7 = vld [vmem:[#allocation2] sm:$0x3] }
  0x10   :  { %599 = vmatpush.msra.mxu0 %v343_v25  ;;  %684 = vadd.xlane.f32.xlu0 %v681_v48 }
  0x11   :  { %619 = vmatpush.msra.mxu1 %v359_v26  ;;  %647 = vmatpush.msra.mxu2 %v367_v35 }
  0x12   :  { %600 = vmatpush.msra.mxu0 %v342_v31  ;;  %719 = vmatmul.msk.f32.vlgmr.msra.gmra.mxu2 %vm830_vm6, %v723_v51 }
  0x13   :  { %620 = vmatpush.msra.mxu1 %v358_v32 }
  0x14   :  { %601 = vmatpush.msra.mxu0 %v341_v39 }
  0x15   :  { %621 = vmatpush.msra.mxu1 %v357_v40 }
  0x16   :  { %602 = vmatpush.msra.mxu0 %v340_v46 }
  0x17   :  { %622 = vmatpush.msra.mxu1 %v356_v47 }
  0x18   :  { %603 = vmatpush.msra.mxu0 %v339_v49 }
  0x19   :  { %623 = vmatpush.msra.mxu1 %v355_v50 }
  0x1a   :  { %604 = vmatpush.msra.mxu0 %v338_v52 }
  0x1b   :  { %624 = vmatpush.msra.mxu1 %v354_v53 }
  0x1c   :  { %605 = vmatpush.msra.mxu0 %v337_v54 }
  0x1d   :  { %625 = vmatpush.msra.mxu1 %v353_v55 }
  0x1e   :  { %606 = vmatpush.msra.mxu0 %v336_v56 }
  0x1f   :  { %626 = vmatpush.msra.mxu1 %v352_v57 }
  0x20   :  { %607 = vmatpush.msra.mxu0 %v335_v58 }
  0x21   :  { %627 = vmatpush.msra.mxu1 %v351_v59  ;;  %716 = vmatmul.msk.f32.vlgmr.msra.gmra.mxu0 %vm818_vm4, %v723_v51 }
  0x22   :  { %717 = vmatmul.msk.f32.vlgmr.msra.gmra.mxu1 %vm822_vm5, %v723_v51 }
  0x83   :  { %v685_v61 = vpop.xlane.xlu0 %684 }
  0x84   :  { %v686_v62 = vadd.f32 %v685_v61, %v675_v60 }
  0x85   :  { %v669_v5 = vpop.f32.mrf.mxu3 }
  0x86   :  { %688 = vst.msk [vmem:[#allocation3] sm:$0x3] %vm95_vm8, %v686_v62 }
  0x8d   :  { %v694_v63 = vld [vmem:[#allocation3] sm:$0x3] }
  0x8e   :  { %695 = vst.msk [vmem:[%s907_s3] sm:$0x3] %vm95_vm8, %v694_v63 }
  0x95   :  { %v649_v0 = vpop.f32.mrf.mxu2 }
  0x9e   :  { %v609_v1 = vpop.f32.mrf.mxu0 }
  0x9f   :  { %v629_v2 = vpop.f32.mrf.mxu1 }
  0xa0   :  { %v630_v3 = vadd.f32 %v629_v2, %v609_v1 }
  0xa2   :  { %v650_v6 = vadd.f32 %v649_v0, %v630_v3 }
  0xa4   :  { %v670_v8 = vadd.f32 %v669_v5, %v650_v6 }
  0xa6   :  { %v672_v9 = vadd.f32 %v670_v8, %v591_v7 }
  0xa8   :  { %674 = vst.msk [vmem:[#allocation2] sm:$0x3] %vm93_vm7, %v672_v9 }
  0xaf   :  { %v692_v4 = vld [vmem:[#allocation2] sm:$0x3] }
  0xb0   :  { %693 = vst.msk [vmem:[%s908_s2] sm:$0x3] %vm93_vm7, %v692_v4 }

</bundles_post_ra>
